<compile_context>
chip_gen: v7x
topology: tpu7x:2x2x1
jax: 0.10.0
libtpu: 0.0.40
codegen_flags: <defaults>
</compile_context>

<pallas_src>
import jax
import jax.numpy as jnp
from jax.experimental import pallas as pl
from jax.experimental.pallas import tpu as pltpu

LANE = 128      # lane width (last-dim alignment)
SUBLANE = 8     # sublane count (second-to-last-dim alignment)


def _round_up(n: int, m: int) -> int:
    return (n + m - 1) // m * m


def _mlp_kernel(x_ref, w1_ref, b1_ref, w2_ref, b2_ref, o_ref):
    # x_ref : (tm, Dp)  bf16        w1_ref: (Dp, Hp) bf16  [pre-transposed (K,N)]
    # b1_ref: (1, Hp)   f32         w2_ref: (Hp, Op) bf16  [pre-transposed (K,N)]
    # b2_ref: (1, Op)   f32         o_ref : (tm, Op) bf16
    x = x_ref[...]

    # fc1 + bias + ReLU (MXU bf16 inputs, f32 accumulation).
    h = jnp.dot(x, w1_ref[...], preferred_element_type=jnp.float32)
    h = jnp.maximum(h + b1_ref[...], 0.0)              # padded hidden cols stay 0

    # fc2 + bias; feed the MXU bf16 operands again.
    y = jnp.dot(h.astype(w2_ref.dtype), w2_ref[...],
                preferred_element_type=jnp.float32)
    o_ref[...] = (y + b2_ref[...]).astype(o_ref.dtype)


def prepare_params(w1, b1, w2, b2, dtype=jnp.bfloat16):
    """One-time (init-path) weight prep: cast, transpose to (K, N), zero-pad.

    w1: (Hn, D), b1: (Hn,), w2: (O, Hn), b2: (O,)   [PyTorch Linear layout]
    Zero padding is exact: padded input columns hit zero weight rows, padded
    hidden units are ReLU(0)=0 into zero w2 rows, padded output columns get
    zero bias and are sliced off after the kernel.
    """
    Hn, D = w1.shape
    O = w2.shape[0]
    Dp = _round_up(D, LANE)
    Hp = _round_up(Hn, LANE)
    Op = _round_up(O, LANE)

    # Canonical (K, N) layouts; transpose + pad happen once here, never per call.
    w1p = jnp.zeros((Dp, Hp), dtype).at[:D, :Hn].set(jnp.asarray(w1, dtype).T)
    w2p = jnp.zeros((Hp, Op), dtype).at[:Hn, :O].set(jnp.asarray(w2, dtype).T)
    # Biases stay f32 (added onto the f32 accumulator; negligible traffic).
    b1p = jnp.zeros((1, Hp), jnp.float32).at[0, :Hn].set(jnp.asarray(b1, jnp.float32))
    b2p = jnp.zeros((1, Op), jnp.float32).at[0, :O].set(jnp.asarray(b2, jnp.float32))

    dims = (D, Hn, O, Dp, Hp, Op)
    return (w1p, b1p, w2p, b2p), dims


def mlp_forward(x, padded_params, dims, tm=256):
    """x: (B, ...) image-like input, flattened along non-batch dims."""
    w1p, b1p, w2p, b2p = padded_params
    D, Hn, O, Dp, Hp, Op = dims

    B = x.shape[0]
    x2d = x.reshape(B, -1).astype(w1p.dtype)           # flatten(start_dim=1), bf16
    assert x2d.shape[1] == D

    # Row tile: multiple of 8 sublanes, at most `tm`, and (when the batch
    # allows) small enough to expose >= 2 row tiles so the "parallel" axis
    # actually shards across v7x's 2 TensorCores.
    tm = _round_up(min(tm, _round_up(B, SUBLANE)), SUBLANE)
    if B > SUBLANE and _round_up(B, tm) // tm < 2:
        tm = _round_up(pl.cdiv(B, 2), SUBLANE)
    Bp = _round_up(B, tm)

    # Skip the x pad copy entirely when already aligned; otherwise pad only
    # the ragged batch tail / lane remainder with zeros (exact).
    if B == Bp and D == Dp:
        xp = x2d
    else:
        xp = jnp.pad(x2d, ((0, Bp - B), (0, Dp - D)))

    grid = (Bp // tm,)
    out_dtype = jnp.bfloat16                            # lane-dense Op -> unmasked vst

    itemsize = jnp.dtype(w1p.dtype).itemsize
    cost = pl.CostEstimate(
        flops=2 * Bp * (Dp * Hp + Hp * Op),
        transcendentals=0,
        bytes_accessed=(Bp * Dp * itemsize            # x
                        + Dp * Hp * itemsize          # w1
                        + Hp * Op * itemsize          # w2
                        + (Hp + Op) * 4               # biases
                        + Bp * Op * jnp.dtype(out_dtype).itemsize),  # out
    )

    out_padded = pl.pallas_call(
        _mlp_kernel,
        out_shape=jax.ShapeDtypeStruct((Bp, Op), out_dtype),
        grid=grid,
        in_specs=[
            pl.BlockSpec((tm, Dp), lambda i: (i, 0)),                 # x row tile
            pl.BlockSpec((Dp, Hp), lambda i: (0, 0),
                         pipeline_mode=pl.Buffered(1)),               # w1 (resident)
            pl.BlockSpec((1, Hp), lambda i: (0, 0),
                         pipeline_mode=pl.Buffered(1)),               # b1
            pl.BlockSpec((Hp, Op), lambda i: (0, 0),
                         pipeline_mode=pl.Buffered(1)),               # w2 (resident)
            pl.BlockSpec((1, Op), lambda i: (0, 0),
                         pipeline_mode=pl.Buffered(1)),               # b2
        ],
        out_specs=pl.BlockSpec((tm, Op), lambda i: (i, 0)),
        compiler_params=pltpu.CompilerParams(
            dimension_semantics=("parallel",),      # shard row tiles across TCs (v7x)
            vmem_limit_bytes=64 * 1024 * 1024,      # budget against v7x 64 MiB physical
        ),
        cost_estimate=cost,
    )(xp, w1p, b1p, w2p, b2p)

    # Slice away sublane (batch) and lane (output) padding.
    return out_padded[:B, :O]


if __name__ == "__main__":
    # Small shapes consistent with the module's forward (flatten of an image-like input).
    batch, C, Hs, Ws = 2, 4, 8, 8
    lenght_x = C * Hs * Ws            # 256
    n_hidden_neurons = 32
    output_layer_lenght = 8

    key = jax.random.PRNGKey(0)
    kx, kw1, kb1, kw2, kb2 = jax.random.split(key, 5)

    x = jax.random.normal(kx, (batch, C, Hs, Ws), dtype=jnp.float32)

    # Deterministic PyTorch-style Linear init: U(-1/sqrt(fan_in), 1/sqrt(fan_in))
    bound1 = 1.0 / (lenght_x ** 0.5)
    w1 = jax.random.uniform(kw1, (n_hidden_neurons, lenght_x),
                            minval=-bound1, maxval=bound1, dtype=jnp.float32)
    b1 = jax.random.uniform(kb1, (n_hidden_neurons,),
                            minval=-bound1, maxval=bound1, dtype=jnp.float32)
    bound2 = 1.0 / (n_hidden_neurons ** 0.5)
    w2 = jax.random.uniform(kw2, (output_layer_lenght, n_hidden_neurons),
                            minval=-bound2, maxval=bound2, dtype=jnp.float32)
    b2 = jax.random.uniform(kb2, (output_layer_lenght,),
                            minval=-bound2, maxval=bound2, dtype=jnp.float32)

    # One-time (init-path) weight prep, then the per-step forward.
    padded_params, dims = prepare_params(w1, b1, w2, b2, dtype=jnp.bfloat16)
    logits = mlp_forward(x, padded_params, dims)
    jax.block_until_ready(logits)

    # Reference computed the same way the kernel does (bf16 operands, f32
    # accumulation) so the bf16 path is checked tightly; also sanity-check
    # against the pure-f32 reference with a bf16-appropriate tolerance.
    x2d = x.reshape(batch, -1)
    xb = x2d.astype(jnp.bfloat16)
    w1b = w1.astype(jnp.bfloat16)
    w2b = w2.astype(jnp.bfloat16)
    h_ref = jnp.maximum(
        jnp.dot(xb, w1b.T, preferred_element_type=jnp.float32) + b1, 0.0)
    ref_bf16 = jnp.dot(h_ref.astype(jnp.bfloat16), w2b.T,
                       preferred_element_type=jnp.float32) + b2
    ref_f32 = jnp.maximum(x2d @ w1.T + b1, 0.0) @ w2.T + b2

    out_f32 = logits.astype(jnp.float32)
    assert logits.shape == (batch, output_layer_lenght)
    assert jnp.allclose(out_f32, ref_bf16, atol=2e-2, rtol=2e-2)
    assert jnp.allclose(out_f32, ref_f32, atol=5e-2, rtol=5e-2)

    print("KERNEL_OK")
</pallas_src>

<mosaic_0001>
module attributes {stable_mosaic.version = 11 : i64} {
  func.func @_mlp_kernel(%arg0: i32, %arg1: memref<8x256xbf16, #tpu.memory_space<vmem>>, %arg2: memref<256x128xbf16, #tpu.memory_space<vmem>>, %arg3: memref<1x128xf32, #tpu.memory_space<vmem>>, %arg4: memref<128x128xbf16, #tpu.memory_space<vmem>>, %arg5: memref<1x128xf32, #tpu.memory_space<vmem>>, %arg6: memref<8x128xbf16, #tpu.memory_space<vmem>>) attributes {dimension_semantics = [#tpu.dimension_semantics<parallel>], iteration_bounds = array<i64: 1>, scalar_prefetch = 0 : i64, scratch_operands = 0 : i64, tpu.core_type = #tpu.core_type<tc>, window_params = [{transform_indices = @transform_0, window_bounds = array<i64: 8, 256>}, {pipeline_mode = #tpu.pipeline_mode<synchronous>, transform_indices = @transform_1, window_bounds = array<i64: 256, 128>}, {pipeline_mode = #tpu.pipeline_mode<synchronous>, transform_indices = @transform_2, window_bounds = array<i64: 1, 128>}, {pipeline_mode = #tpu.pipeline_mode<synchronous>, transform_indices = @transform_3, window_bounds = array<i64: 128, 128>}, {pipeline_mode = #tpu.pipeline_mode<synchronous>, transform_indices = @transform_4, window_bounds = array<i64: 1, 128>}, {transform_indices = @transform_5, window_bounds = array<i64: 8, 128>}]} {
    %c0 = arith.constant 0 : index
    %c0_0 = arith.constant 0 : index
    %0 = vector.load %arg1[%c0, %c0_0] : memref<8x256xbf16, #tpu.memory_space<vmem>>, vector<8x256xbf16>
    %c0_1 = arith.constant 0 : index
    %c0_2 = arith.constant 0 : index
    %1 = vector.load %arg2[%c0_1, %c0_2] : memref<256x128xbf16, #tpu.memory_space<vmem>>, vector<256x128xbf16>
    %cst = arith.constant dense<0.000000e+00> : vector<8x128xf32>
    %2 = tpu.matmul %0, %1, %cst {dimension_numbers = #tpu.dot_dimension_numbers<[1], [0], [0], [1], [0, 0, 1, 1], [], []>} : vector<8x256xbf16>, vector<256x128xbf16>, vector<8x128xf32> -> vector<8x128xf32>
    %c0_3 = arith.constant 0 : index
    %c0_4 = arith.constant 0 : index
    %3 = vector.load %arg3[%c0_3, %c0_4] : memref<1x128xf32, #tpu.memory_space<vmem>>, vector<1x128xf32>
    %4 = vector.broadcast %3 : vector<1x128xf32> to vector<8x128xf32>
    %5 = arith.addf %2, %4 : vector<8x128xf32>
    %cst_5 = arith.constant 0.000000e+00 : f32
    %6 = vector.broadcast %cst_5 : f32 to vector<8x128xf32>
    %7 = arith.maximumf %5, %6 : vector<8x128xf32>
    %8 = arith.truncf %7 : vector<8x128xf32> to vector<8x128xbf16>
    %c0_6 = arith.constant 0 : index
    %c0_7 = arith.constant 0 : index
    %9 = vector.load %arg4[%c0_6, %c0_7] : memref<128x128xbf16, #tpu.memory_space<vmem>>, vector<128x128xbf16>
    %cst_8 = arith.constant dense<0.000000e+00> : vector<8x128xf32>
    %10 = tpu.matmul %8, %9, %cst_8 {dimension_numbers = #tpu.dot_dimension_numbers<[1], [0], [0], [1], [0, 0, 1, 1], [], []>} : vector<8x128xbf16>, vector<128x128xbf16>, vector<8x128xf32> -> vector<8x128xf32>
    %c0_9 = arith.constant 0 : index
    %c0_10 = arith.constant 0 : index
    %11 = vector.load %arg5[%c0_9, %c0_10] : memref<1x128xf32, #tpu.memory_space<vmem>>, vector<1x128xf32>
    %12 = vector.broadcast %11 : vector<1x128xf32> to vector<8x128xf32>
    %13 = arith.addf %10, %12 : vector<8x128xf32>
    %14 = arith.truncf %13 : vector<8x128xf32> to vector<8x128xbf16>
    %c0_11 = arith.constant 0 : index
    %c0_12 = arith.constant 0 : index
    %15 = vector.load %arg6[%c0_11, %c0_12] : memref<8x128xbf16, #tpu.memory_space<vmem>>, vector<8x128xbf16>
    tpu.vector_store %arg6[%c0_11, %c0_12], %14 {strides = array<i32>} : memref<8x128xbf16, #tpu.memory_space<vmem>>, vector<8x128xbf16>,
    return
  }
  func.func @transform_0(%arg0: i32) -> (i32, i32) {
    %c0_i32 = arith.constant 0 : i32
    %c0_i32_0 = arith.constant 0 : i32
    return %arg0, %c0_i32 : i32, i32
  }
  func.func @transform_1(%arg0: i32) -> (i32, i32) {
    %c0_i32 = arith.constant 0 : i32
    %c0_i32_0 = arith.constant 0 : i32
    %c0_i32_1 = arith.constant 0 : i32
    return %c0_i32, %c0_i32_0 : i32, i32
  }
  func.func @transform_2(%arg0: i32) -> (i32, i32) {
    %c0_i32 = arith.constant 0 : i32
    %c0_i32_0 = arith.constant 0 : i32
    %c0_i32_1 = arith.constant 0 : i32
    return %c0_i32, %c0_i32_0 : i32, i32
  }
  func.func @transform_3(%arg0: i32) -> (i32, i32) {
    %c0_i32 = arith.constant 0 : i32
    %c0_i32_0 = arith.constant 0 : i32
    %c0_i32_1 = arith.constant 0 : i32
    return %c0_i32, %c0_i32_0 : i32, i32
  }
  func.func @transform_4(%arg0: i32) -> (i32, i32) {
    %c0_i32 = arith.constant 0 : i32
    %c0_i32_0 = arith.constant 0 : i32
    %c0_i32_1 = arith.constant 0 : i32
    return %c0_i32, %c0_i32_0 : i32, i32
  }
  func.func @transform_5(%arg0: i32) -> (i32, i32) {
    %c0_i32 = arith.constant 0 : i32
    %c0_i32_0 = arith.constant 0 : i32
    return %arg0, %c0_i32 : i32, i32
  }
}

</mosaic_0001>

<bundles_post_ra>
// kernel: tpu_custom_call.1
= control target key start
LH: loop header
LB: loop body
LE: loop exit
PB: predicated region body
PF: predicated region fallthrough
CT: control target
= control target key end

     0   :  { %10 = vsyncpa [#allocation3], 0  ;;  %s775_s0 = inlined_call_operand.hbm [shape: bf16[8,256], index: 0, kind: input, shape index: {}]   ;;  %s776_s1 = inlined_call_operand.hbm [shape: bf16[256,128], index: 1, kind: input, shape index: {}]   ;;  %s777_s2 = inlined_call_operand.hbm [shape: f32[1,128], index: 2, kind: input, shape index: {}]   ;;  %s778_s3 = inlined_call_operand.hbm [shape: bf16[128,128], index: 3, kind: input, shape index: {}]   ;;  %s779_s4 = inlined_call_operand.hbm [shape: f32[1,128], index: 4, kind: input, shape index: {}]   ;;  %s780_s5 = inlined_call_operand.hbm [shape: bf16[8,128], index: 5, kind: output, shape index: {}]  }
   0x1   :  { %11 = vsyncpa [#allocation6], 0 }
   0x2   :  { %12 = vsyncpa [#allocation9], 0 }
   0x3   :  { %13 = vsyncpa [#allocation4], 0  ;;  %s654_s18 = smov [#allocation5]   ;;  %s514_s22 = scalar_lea.hbm %s776_s1, 2048 }
   0x4   :  { %s29_s19 = sshll.u32 %s654_s18, 4  ;;  %p515_p0 = scmp.ne.s32.totalorder %s776_s1, %s514_s22  ;;  %s30_s19 = int_to_ptr.vmem [resolvable:$true] %s29_s19 }
   0x5   :  { %p518_p1 = scmp.lt.u32.totalorder %s514_s22, %s776_s1 }
   0x7   :  { %p520_p2 = pnand %p518_p1, %p515_p0 }
   0x9   :  { %523 = shalt.err (!%p520_p2)
}
   0xa   :  { %s524_s27 = scalar_lea.vmem %s30_s19, 2048  ;;  %p529_p4 = scmp.lt.s32.totalorder %s30_s19, %s30_s19 }
   0xb   :  { %p525_p3 = scmp.ne.s32.totalorder %s30_s19, %s524_s27  ;;  %p530_p5 = scmp.lt.s32.totalorder %s524_s27, %s524_s27 }
   0xd   :  { %p531_p6 = por %p530_p5, %p529_p4 }
   0xf   :  { %p532_p7 = pnand %p531_p6, %p525_p3 }
  0x11   :  { %535 = shalt.err (!%p532_p7)
}
  0x12   :  { %s655_s28 = smov 64   ;;  %s656_s29 = smov 4  }
  0x13   :  { %35 = dma.hbm_to_vmem [thread:$0]  %s776_s1, 2048, %s30_s19, [#allocation6], %s655_s28, %s655_s28, %s656_s29  }
  0x14   :  { %s657_s7 = smov [#allocation8]   ;;  %s658_s9 = smov [#allocation2]  }
  0x15   :  { %s51_s8 = sshll.u32 %s657_s7, 4  ;;  %s20_s10 = sshll.u32 %s658_s9, 4  ;;  %s52_s8 = int_to_ptr.vmem [resolvable:$true] %s51_s8  ;;  %s21_s10 = int_to_ptr.vmem [resolvable:$true] %s20_s10 }
  0x16   :  { %s536_s13 = scalar_lea.hbm %s778_s3, 1024 }
  0x17   :  { %p537_p8 = scmp.ne.s32.totalorder %s778_s3, %s536_s13  ;;  %p540_p9 = scmp.lt.u32.totalorder %s536_s13, %s778_s3 }
  0x19   :  { %p542_p10 = pnand %p540_p9, %p537_p8 }
  0x1b   :  { %545 = shalt.err (!%p542_p10)
}
  0x1c   :  { %s546_s1 = scalar_lea.vmem %s52_s8, 1024  ;;  %p551_p12 = scmp.lt.s32.totalorder %s52_s8, %s52_s8 }
  0x1d   :  { %p547_p11 = scmp.ne.s32.totalorder %s52_s8, %s546_s1  ;;  %p552_p13 = scmp.lt.s32.totalorder %s546_s1, %s546_s1 }
  0x1f   :  { %p553_p0 = por %p552_p13, %p551_p12 }
  0x21   :  { %p554_p1 = pnand %p553_p0, %p547_p11 }
  0x23   :  { %557 = shalt.err (!%p554_p1)
}
  0x24   :  { %57 = dma.hbm_to_vmem [thread:$0]  %s778_s3, 1024, %s52_s8, [#allocation9], %s655_s28, %s655_s28, %s656_s29  }
  0x25   :  { %s558_s22 = scalar_lea.hbm %s775_s0, 128 }
  0x26   :  { %p559_p2 = scmp.ne.s32.totalorder %s775_s0, %s558_s22  ;;  %p562_p3 = scmp.lt.u32.totalorder %s558_s22, %s775_s0 }
  0x28   :  { %p564_p4 = pnand %p562_p3, %p559_p2 }
  0x2a   :  { %567 = shalt.err (!%p564_p4)
}
  0x2b   :  { %s568_s27 = scalar_lea.vmem %s21_s10, 128  ;;  %p573_p6 = scmp.lt.s32.totalorder %s21_s10, %s21_s10 }
  0x2c   :  { %p569_p5 = scmp.ne.s32.totalorder %s21_s10, %s568_s27  ;;  %p574_p7 = scmp.lt.s32.totalorder %s568_s27, %s568_s27 }
  0x2e   :  { %p575_p8 = por %p574_p7, %p573_p6 }
  0x30   :  { %p576_p9 = pnand %p575_p8, %p569_p5 }
  0x32   :  { %579 = shalt.err (!%p576_p9)
}
  0x33   :  { %23 = dma.hbm_to_vmem [thread:$0]  %s775_s0, 128, %s21_s10, [#allocation3]  }
  0x34   :  { %s659_s29 = smov [#allocation7]   ;;  %s660_s6 = smov [#allocation10]  }
  0x35   :  { %s42_s30 = sshll.u32 %s659_s29, 4  ;;  %s64_s7 = sshll.u32 %s660_s6, 4  ;;  %s43_s30 = int_to_ptr.vmem [resolvable:$true] %s42_s30  ;;  %s65_s7 = int_to_ptr.vmem [resolvable:$true] %s64_s7 }
  0x36   :  { %s580_s11 = scalar_lea.hbm %s777_s2, 16 }
  0x37   :  { %p581_p10 = scmp.ne.s32.totalorder %s777_s2, %s580_s11  ;;  %p584_p11 = scmp.lt.u32.totalorder %s580_s11, %s777_s2 }
  0x39   :  { %p586_p12 = pnand %p584_p11, %p581_p10 }
  0x3b   :  { %589 = shalt.err (!%p586_p12)
}
  0x3c   :  { %s590_s0 = scalar_lea.vmem %s43_s30, 16  ;;  %s594_s10 = scalar_lea.vmem %s43_s30, 32 }
  0x3d   :  { %p591_p13 = scmp.ne.s32.totalorder %s43_s30, %s590_s0  ;;  %p595_p0 = scmp.lt.s32.totalorder %s43_s30, %s43_s30 }
  0x3e   :  { %p596_p1 = scmp.lt.s32.totalorder %s594_s10, %s590_s0 }
  0x40   :  { %p597_p2 = por %p596_p1, %p595_p0 }
  0x42   :  { %p598_p3 = pnand %p597_p2, %p591_p13 }
  0x44   :  { %601 = shalt.err (!%p598_p3)
}
  0x45   :  { %45 = dma.hbm_to_vmem [thread:$0]  %s777_s2, 16, %s43_s30, [#allocation6]  }
  0x46   :  { %s602_s19 = scalar_lea.hbm %s779_s4, 16 }
  0x47   :  { %p603_p4 = scmp.ne.s32.totalorder %s779_s4, %s602_s19  ;;  %p606_p5 = scmp.lt.u32.totalorder %s602_s19, %s779_s4 }
  0x49   :  { %p608_p6 = pnand %p606_p5, %p603_p4 }
  0x4b   :  { %611 = shalt.err (!%p608_p6)
}
  0x4c   :  { %s612_s24 = scalar_lea.vmem %s65_s7, 16  ;;  %s616_s25 = scalar_lea.vmem %s65_s7, 32 }
  0x4d   :  { %p613_p7 = scmp.ne.s32.totalorder %s65_s7, %s612_s24  ;;  %p617_p8 = scmp.lt.s32.totalorder %s65_s7, %s65_s7 }
  0x4e   :  { %p618_p9 = scmp.lt.s32.totalorder %s616_s25, %s612_s24 }
  0x50   :  { %p619_p10 = por %p618_p9, %p617_p8 }
  0x52   :  { %p620_p11 = pnand %p619_p10, %p613_p7 }
  0x54   :  { %623 = shalt.err (!%p620_p11)
}
  0x55   :  { %67 = dma.hbm_to_vmem [thread:$0]  %s779_s4, 16, %s65_s7, [#allocation9]  }
  0x56   :  { %646 = dma.done.wait [#allocation3], 128  }
  0x57   :  { %647 = vsyncadd [#allocation3], 4294967168 }
  0x58   :  { %648 = dma.done.wait [#allocation6], 2064  }
  0x59   :  { %649 = vsyncadd [#allocation6], 4294965232 }
  0x5a   :  { %650 = dma.done.wait [#allocation9], 1040  }
  0x5b   :  { %651 = vsyncadd [#allocation9], 4294966256  ;;  %v661_v0 = vmov 0.0   ;;  %v488_v1 = vld [vmem:[#allocation5 + $0x40] sm:$0xff]   ;;  %v490_v3 = vld [vmem:[#allocation5 + $0x48] sm:$0xff]   ;;  %vm662_vm0 = vmmov 0  }
  0x5c   :  { %458 = vmatprep.subr.bf16.mxu1 %v661_v0  ;;  %v489_v2 = vld [vmem:[#allocation5] sm:$0xff]   ;;  %427 = vmatprep.subr.bf16.mxu0 %v488_v1  ;;  %v491_v4 = vld [vmem:[#allocation5 + $0x8] sm:$0xff]   ;;  %v492_v5 = vld [vmem:[#allocation5 + $0x50] sm:$0xff]   ;;  %s663_s4 = smov [#allocation11]  }
  0x5d   :  { %428 = vmatpush3.bf16.msra.mxu0 %v489_v2  ;;  %v493_v6 = vld [vmem:[#allocation5 + $0x10] sm:$0xff]   ;;  %v494_v7 = vld [vmem:[#allocation5 + $0x58] sm:$0xff]   ;;  %v496_v9 = vld [vmem:[#allocation5 + $0x60] sm:$0xff]   ;;  %474 = vmatprep.mubr.msk.bf16.mxu1 %vm662_vm0, %v661_v0  ;;  %s388_s27 = sshll.u32 %s663_s4, 4  ;;  %s389_s27 = int_to_ptr.vmem [resolvable:$true] %s388_s27 }
  0x5e   :  { %429 = vmatprep.subr.bf16.mxu0 %v490_v3  ;;  %v495_v8 = vld [vmem:[#allocation5 + $0x18] sm:$0xff]   ;;  %v497_v10 = vld [vmem:[#allocation5 + $0x20] sm:$0xff]   ;;  %v498_v11 = vld [vmem:[#allocation5 + $0x68] sm:$0xff]   ;;  %s624_s3 = scalar_lea.vmem %s389_s27, 64  ;;  %p629_p13 = scmp.lt.s32.totalorder %s389_s27, %s389_s27 }
  0x5f   :  { %v84_v12 = vld [vmem:[#allocation2] sm:$0xff]  ;;  %v506_v14 = vld [vmem:[#allocation8] sm:$0xff]   ;;  %v500_v16 = vld [vmem:[#allocation5 + $0x70] sm:$0xff]   ;;  %p625_p12 = scmp.ne.s32.totalorder %s389_s27, %s624_s3  ;;  %p630_p0 = scmp.lt.s32.totalorder %s624_s3, %s624_s3 }
  0x60   :  { %v401_v13 = vcombine.high %v84_v12, %v84_v12  ;;  %v499_v15 = vld [vmem:[#allocation5 + $0x28] sm:$0xff]   ;;  %459 = vmatpush3.bf16.msra.mxu1 %v506_v14  ;;  %v501_v18 = vld [vmem:[#allocation5 + $0x30] sm:$0xff]   ;;  %v502_v19 = vld [vmem:[#allocation5 + $0x78] sm:$0xff]   ;;  %v400_v23 = vcombine.low %v84_v12, %v84_v12 }
  0x61   :  { %430 = vmatpush3.bf16.msra.mxu0 %v491_v4  ;;  %v507_v17 = vld [vmem:[#allocation8 + $0x8] sm:$0xff]   ;;  %460 = vmatprep.subr.bf16.mxu1 %v661_v0  ;;  %v508_v20 = vld [vmem:[#allocation8 + $0x10] sm:$0xff]   ;;  %v509_v22 = vld [vmem:[#allocation8 + $0x18] sm:$0xff]   ;;  %p631_p1 = por %p630_p0, %p629_p13 }
  0x62   :  { %431 = vmatprep.subr.bf16.mxu0 %v492_v5  ;;  %259 = vmatprep.mubr.bf16.mxu0 %v401_v13  ;;  %v503_v21 = vld [vmem:[#allocation5 + $0x38] sm:$0xff]   ;;  %v510_v24 = vld [vmem:[#allocation8 + $0x20] sm:$0xff]   ;;  %v511_v25 = vld [vmem:[#allocation8 + $0x28] sm:$0xff]  }
  0x63   :  { %v512_v26 = vld [vmem:[#allocation8 + $0x30] sm:$0xff]   ;;  %v513_v27 = vld [vmem:[#allocation8 + $0x38] sm:$0xff]   ;;  %v418_v37 = vld [vmem:[#allocation10] ss:$0 sm:$0xff]  ;;  %p632_p2 = pnand %p631_p1, %p625_p12 }
  0x64   :  { %461 = vmatpush3.bf16.msra.mxu1 %v507_v17  ;;  %v399_v29 = vld [vmem:[#allocation7] ss:$0 sm:$0xff] }
  0x65   :  { %432 = vmatpush3.bf16.msra.mxu0 %v493_v6  ;;  %462 = vmatprep.subr.bf16.mxu1 %v661_v0 }
  0x66   :  { %433 = vmatprep.subr.bf16.mxu0 %v494_v7 }
  0x68   :  { %463 = vmatpush3.bf16.msra.mxu1 %v508_v20 }
  0x69   :  { %434 = vmatpush3.bf16.msra.mxu0 %v495_v8  ;;  %464 = vmatprep.subr.bf16.mxu1 %v661_v0 }
  0x6a   :  { %435 = vmatprep.subr.bf16.mxu0 %v496_v9 }
  0x6c   :  { %465 = vmatpush3.bf16.msra.mxu1 %v509_v22 }
  0x6d   :  { %436 = vmatpush3.bf16.msra.mxu0 %v497_v10  ;;  %466 = vmatprep.subr.bf16.mxu1 %v661_v0 }
  0x6e   :  { %437 = vmatprep.subr.bf16.mxu0 %v498_v11 }
  0x70   :  { %467 = vmatpush3.bf16.msra.mxu1 %v510_v24 }
  0x71   :  { %438 = vmatpush3.bf16.msra.mxu0 %v499_v15  ;;  %468 = vmatprep.subr.bf16.mxu1 %v661_v0 }
  0x72   :  { %439 = vmatprep.subr.bf16.mxu0 %v500_v16 }
  0x74   :  { %469 = vmatpush3.bf16.msra.mxu1 %v511_v25 }
  0x75   :  { %440 = vmatpush3.bf16.msra.mxu0 %v501_v18  ;;  %470 = vmatprep.subr.bf16.mxu1 %v661_v0 }
  0x76   :  { %441 = vmatprep.subr.bf16.mxu0 %v502_v19 }
  0x78   :  { %471 = vmatpush3.bf16.msra.mxu1 %v512_v26 }
  0x79   :  { %442 = vmatpush3.bf16.msra.mxu0 %v503_v21  ;;  %472 = vmatprep.subr.bf16.mxu1 %v661_v0 }
  0x7c   :  { %260 = vmatmul.mubr.bf16.vlgmr.msra.gmra.mrb[0].mxu0 %v400_v23  ;;  %473 = vmatpush3.bf16.msra.mxu1 %v513_v27 }
 0x14f   :  { %v443_v28 = vpop.f32.mrb[0].mxu0 }
 0x150   :  { %v444_v30 = vpop.f32.mrb[1].mxu0 }
 0x151   :  { %v445_v31 = vadd.f32 %v444_v30, %v443_v28  ;;  %v446_v32 = vpop.f32.mrb[2].mxu0 }
 0x152   :  { %v447_v33 = vpop.f32.mrb[3].mxu0 }
 0x153   :  { %v262_v34 = vadd.f32 %v445_v31, %v399_v29 }
 0x155   :  { %v267_v35 = vmax.f32 %v262_v34, 0.0 }
 0x157   :  { %v268_v36 = vpack.c.bf16 %v267_v35, %v267_v35 }
 0x159   :  { %475 = vmatmul.mubr.bf16.vlgmr.msra.gmra.mrb[0].mxu1 %v268_v36 }
 0x22c   :  { %v374_v38 = vpop.f32.mrb[0].mxu1 }
 0x22d   :  { %v375_v39 = vadd.f32 %v418_v37, %v374_v38  ;;  %v476_v40 = vpop.f32.mrb[1].mxu1 }
 0x22e   :  { %v377_v41 = vpop.f32.mrb[2].mxu1 }
 0x22f   :  { %v380_v42 = vpack.c.bf16 %v375_v39, %v375_v39  ;;  %v477_v43 = vpop.f32.mrb[3].mxu1 }
 0x231   :  { %381 = vst [vmem:[#allocation11] sm:$0xf] %v380_v42 }
 0x232   :  { %635 = shalt.err (!%p632_p2)
}
 0x233   :  { %s636_s30 = scalar_lea.hbm %s780_s5, 64 }
 0x234   :  { %p637_p3 = scmp.ne.s32.totalorder %s780_s5, %s636_s30  ;;  %p640_p4 = scmp.lt.u32.totalorder %s636_s30, %s780_s5 }
 0x236   :  { %p642_p5 = pnand %p640_p4, %p637_p3 }
 0x238   :  { %645 = shalt.err (!%p642_p5)
}
 0x239   :  { %391 = dma.vmem_to_hbm [thread:$0]  %s389_s27, 64, %s780_s5, [#allocation4]  }
 0x23a   :  { %652 = dma.done.wait [#allocation4], 64  }
 0x23b   :  { %653 = vsyncadd [#allocation4], 4294967232 }
 0x23c   :  { %395 = vsyncpa [#allocation3], 1 }
 0x23d   :  { %396 = vsyncpa [#allocation6], 1 }
 0x23e   :  { %397 = vsyncpa [#allocation9], 1 }
 0x23f   :  { %398 = vsyncpa [#allocation4], 1 }

</bundles_post_ra>
